<compile_context>
chip_gen: v5e
topology: v5e:2x2
jax: 0.10.0
libtpu: 0.0.40
codegen_flags: <defaults>
</compile_context>

<pallas_src>
import numpy as np
import jax
import jax.numpy as jnp
from jax import lax
from jax.experimental import pallas as pl
from jax.experimental.pallas import tpu as pltpu  # noqa: F401  (TPU backend)


def _round_up(x, m):
    return -(-x // m) * m


# ---------------------------------------------------------------------------
# Init-time parameter preparation (runs once, outside the forward path)
# ---------------------------------------------------------------------------
def fold_bn(w, b, gamma, beta, mean, var, eps=1e-5):
    """Fold eval-mode BatchNorm1d into the preceding conv's weight/bias."""
    scale = gamma / jnp.sqrt(var + eps)
    return w * scale[:, None, None], (b - mean) * scale + beta


def pad_cin(w, c_in_target):
    """Zero-pad a conv weight's C_in axis up to c_in_target (sublane alignment)."""
    _, c_in, _ = w.shape
    if c_in == c_in_target:
        return w
    return jnp.pad(w, ((0, 0), (0, c_in_target - c_in), (0, 0)))


def conv_weight_mat(w):
    """(C_out, C_in, K) -> (C_out, K*C_in) with column index k*C_in + ci."""
    c_out, c_in, k = w.shape
    return jnp.transpose(w, (0, 2, 1)).reshape(c_out, k * c_in)


def conv_gather_mat(l_in, l_out, k, stride, pad_l, n):
    """0/1 gather matrix G: (N*L_in, K*N*L_out).

    (h @ G)[ci, kk*(N*L_out) + nn*L_out + m] = h_padded[ci, nn, stride*m + kk - pad_l]
    (zero outside the valid range -> zero-padding semantics)."""
    g = np.zeros((n * l_in, k * n * l_out), np.float32)
    for kk in range(k):
        for nn in range(n):
            for m in range(l_out):
                j = stride * m + kk - pad_l
                if 0 <= j < l_in:
                    g[nn * l_in + j, kk * n * l_out + nn * l_out + m] = 1.0
    return jnp.asarray(g)


def pool_gather_mat(l_in, a_len, n):
    """AdaptiveAvgPool1d(a_len) as a gather matrix: (N*L_in, a_len*N).

    (h @ G)[c, a*N + nn] = mean over PyTorch's adaptive bin a of sample nn."""
    g = np.zeros((n * l_in, a_len * n), np.float32)
    for a in range(a_len):
        s_i = (a * l_in) // a_len
        e_i = -(-((a + 1) * l_in) // a_len)  # ceil
        w = 1.0 / (e_i - s_i)
        for nn in range(n):
            g[nn * l_in + s_i:nn * l_in + e_i, a * n + nn] = w
    return jnp.asarray(g)


def prepare_fused_inputs(params, kernel_sizes, strides, residual, n_batch, length,
                         adaptive_len, n_classes):
    """Precompute (once) all folded weights + structural matrices fed to the kernel."""
    hi = jax.lax.Precision.HIGHEST
    ops = []
    block_meta = []
    in_c, l_cur = 1, length
    h_rows = _round_up(in_c, 8)   # the wrapper pads the input channels to this count

    for p, k, s in zip(params['blocks'], kernel_sizes, strides):
        c_out = p['w1'].shape[0]
        if s == 2:                       # PyTorch: padding=0 when stride==2
            p1_l = p1_r = 0
        else:                            # padding='same'
            p1_l = (k - 1) // 2
            p1_r = (k - 1) - p1_l
        l_out = (l_cur + p1_l + p1_r - k) // s + 1

        w1f, b1f = fold_bn(p['w1'], p['b1'], *p['bn1'])
        w2f, b2f = fold_bn(p['w2'], p['b2'], *p['bn2'])
        has_adapter = p['wa'] is not None

        # conv1 (+ adapter, which shares conv1's geometry/im2col) -> one matmul.
        w1m = conv_weight_mat(pad_cin(w1f, h_rows))
        b1v = b1f
        if has_adapter:
            w1m = jnp.concatenate(
                [w1m, conv_weight_mat(pad_cin(p['wa'], h_rows))], axis=0)
            b1v = jnp.concatenate([b1f, p['ba']], axis=0)
        g1 = conv_gather_mat(l_cur, l_out, k, s, p1_l, n_batch)
        ops += [g1, w1m, b1v.reshape(-1, 1)]

        # conv2: stride 1, padding='same' -> preserves length.
        g2 = conv_gather_mat(l_out, l_out, k, 1, (k - 1) // 2, n_batch)
        ops += [g2, conv_weight_mat(w2f), b2f.reshape(c_out, 1)]

        block_meta.append((k, c_out, has_adapter, bool(residual)))
        in_c, l_cur = c_out, l_out
        h_rows = c_out

    # Head: adaptive pool folded into the same gather pattern; linear1 re-laid out so
    # that W1arr[f, a*C + c] == W1[f, c*A + a] (matches x2.view(N, -1) flattening).
    # linear2(dropout(linear1(.))) has no activation in between -> fold into ONE affine.
    c_last = in_c
    gh = pool_gather_mat(l_cur, adaptive_len, n_batch)
    w1 = params['W1']
    f_feat = w1.shape[0]
    w1arr = jnp.transpose(w1.reshape(f_feat, c_last, adaptive_len),
                          (0, 2, 1)).reshape(f_feat, adaptive_len * c_last)
    w_head = jnp.dot(params['W2'], w1arr, precision=hi)                  # (classes, A*C)
    b_head = jnp.dot(params['W2'], params['b1'], precision=hi) + params['b2']
    ops += [gh, w_head, b_head.reshape(n_classes, 1)]
    return tuple(ops), tuple(block_meta)


# ---------------------------------------------------------------------------
# Fused Pallas kernel
# ---------------------------------------------------------------------------
def _conv(h, gcat, k, w_mat, b_col):
    """out = W_mat @ im2col(h) + b, with im2col built by one lane-gather matmul.

    h: (C_in, M_in); gcat: (M_in, k*M_out); w_mat: (rows, k*C_in); b_col: (rows, 1)."""
    c_in = h.shape[0]
    m_out = gcat.shape[1] // k
    x = jnp.dot(h, gcat, preferred_element_type=jnp.float32)        # (C_in, k*M_out)
    if k == 1:
        return jnp.dot(w_mat, x, preferred_element_type=jnp.float32) + b_col
    if c_in % 8 == 0:
        # Aligned sublane concat -> single im2col matmul on the MXU.
        xcol = jnp.concatenate(
            [x[:, g * m_out:(g + 1) * m_out] for g in range(k)], axis=0)
        return jnp.dot(w_mat, xcol, preferred_element_type=jnp.float32) + b_col
    # C_in not sublane-aligned: per-tap accumulation (not hit with padded inputs).
    acc = jnp.dot(w_mat[:, :c_in], x[:, :m_out], preferred_element_type=jnp.float32)
    for g in range(1, k):
        acc = acc + jnp.dot(w_mat[:, g * c_in:(g + 1) * c_in],
                            x[:, g * m_out:(g + 1) * m_out],
                            preferred_element_type=jnp.float32)
    return acc + b_col


def build_fused_kernel(block_meta, adaptive_len, n_classes):
    def kernel(*refs):
        *in_refs, o_ref = refs
        it = iter(in_refs)
        h = next(it)[...]                                 # (C_pad, N*L0), f32
        for ksz, c_out, has_adapter, residual in block_meta:
            g1 = next(it)[...]
            w1 = next(it)[...]
            b1 = next(it)[...]
            g2 = next(it)[...]
            w2 = next(it)[...]
            b2 = next(it)[...]

            # conv1 (+bn1) and (optional) adapter share one im2col / one matmul.
            y = _conv(h, g1, ksz, w1, b1)                 # (c_out or 2*c_out, M1)
            out1 = jnp.maximum(y[:c_out, :], 0.0)         # relu(conv1+bn1)
            identity = None
            if residual:
                identity = y[c_out:, :] if has_adapter else h[:c_out, :]
            out2 = _conv(out1, g2, ksz, w2, b2)           # conv2+bn2
            if residual:
                out2 = out2 + identity
            h = jnp.maximum(out2, 0.0)

        # Head: pool+flatten+linear1+dropout(identity)+linear2 folded into one affine.
        gh = next(it)[...]
        wh = next(it)[...]
        bh = next(it)[...]
        logits = _conv(h, gh, adaptive_len, wh, bh)       # (classes, N)

        # Stable softmax over classes (rows), unrolled -> no cross-sublane reduction.
        m = logits[0:1, :]
        for i in range(1, n_classes):
            m = jnp.maximum(m, logits[i:i + 1, :])
        e = jnp.exp(logits - m)
        s = e[0:1, :]
        for i in range(1, n_classes):
            s = s + e[i:i + 1, :]
        o_ref[...] = (e / s).astype(o_ref.dtype)

    return kernel


def cnn_forward(x, fused_inputs, block_meta, adaptive_len, n_classes):
    """x: (N, 1, L) -> class probabilities (N, n_classes)."""
    n, c_in, length = x.shape
    # Activation layout inside the kernel: channels on sublanes, batch*length on lanes.
    x2d = jnp.transpose(x, (1, 0, 2)).reshape(c_in, n * length).astype(jnp.float32)
    c_pad = _round_up(c_in, 8)
    if c_pad != c_in:   # pad channels to a full sublane group (weights padded to match)
        x2d = jnp.pad(x2d, ((0, c_pad - c_in), (0, 0)))
    kernel = build_fused_kernel(block_meta, adaptive_len, n_classes)
    probs_t = pl.pallas_call(
        kernel,
        out_shape=jax.ShapeDtypeStruct((n_classes, n), jnp.float32),
    )(x2d, *fused_inputs)
    return probs_t.T   # tiny (classes, N) -> (N, classes) flip outside the kernel


# ---------------------------------------------------------------------------
# Parameter initialization (same structure as the PyTorch module)
# ---------------------------------------------------------------------------
def init_params(key, n_filters, kernel_sizes, strides, residual, fc_features,
                adaptive_len, n_classes):
    params = {'blocks': []}
    in_c = 1
    for filters, k, s in zip(n_filters, kernel_sizes, strides):
        key, *ks = jax.random.split(key, 16)
        blk = {
            'w1': 0.2 * jax.random.normal(ks[0], (filters, in_c, k), jnp.float32),
            'b1': 0.1 * jax.random.normal(ks[1], (filters,), jnp.float32),
            'bn1': (1.0 + 0.1 * jax.random.normal(ks[2], (filters,)),
                    0.1 * jax.random.normal(ks[3], (filters,)),
                    0.1 * jax.random.normal(ks[4], (filters,)),
                    1.0 + 0.1 * jnp.abs(jax.random.normal(ks[5], (filters,)))),
            'w2': 0.2 * jax.random.normal(ks[6], (filters, filters, k), jnp.float32),
            'b2': 0.1 * jax.random.normal(ks[7], (filters,), jnp.float32),
            'bn2': (1.0 + 0.1 * jax.random.normal(ks[8], (filters,)),
                    0.1 * jax.random.normal(ks[9], (filters,)),
                    0.1 * jax.random.normal(ks[10], (filters,)),
                    1.0 + 0.1 * jnp.abs(jax.random.normal(ks[11], (filters,)))),
        }
        if (in_c != filters or s == 2) and residual:
            blk['wa'] = 0.2 * jax.random.normal(ks[12], (filters, in_c, k), jnp.float32)
            blk['ba'] = 0.1 * jax.random.normal(ks[13], (filters,), jnp.float32)
        else:
            blk['wa'], blk['ba'] = None, None
        params['blocks'].append(blk)
        in_c = filters

    key, k1, k2, k3, k4 = jax.random.split(key, 5)
    params['W1'] = 0.2 * jax.random.normal(k1, (fc_features, n_filters[-1] * adaptive_len), jnp.float32)
    params['b1'] = 0.1 * jax.random.normal(k2, (fc_features,), jnp.float32)
    params['W2'] = 0.2 * jax.random.normal(k3, (n_classes, fc_features), jnp.float32)
    params['b2'] = 0.1 * jax.random.normal(k4, (n_classes,), jnp.float32)
    return params


# ---------------------------------------------------------------------------
# Pure-JAX reference (mirrors the PyTorch module, eval mode) for validation
# ---------------------------------------------------------------------------
def reference_forward(x, params, kernel_sizes, strides, residual, adaptive_len):
    hi = lax.Precision.HIGHEST

    def conv1d(inp, w, b, stride, pad):
        out = lax.conv_general_dilated(
            inp, w, window_strides=(stride,), padding=[pad],
            dimension_numbers=('NCH', 'OIH', 'NCH'), precision=hi)
        return out + b[None, :, None]

    def bn(inp, gamma, beta, mean, var, eps=1e-5):
        return ((inp - mean[None, :, None])
                * (gamma[None, :, None] / jnp.sqrt(var[None, :, None] + eps))
                + beta[None, :, None])

    h = x
    for p, k, s in zip(params['blocks'], kernel_sizes, strides):
        pad = (0, 0) if s == 2 else ((k - 1) // 2, (k - 1) - (k - 1) // 2)
        out = jnp.maximum(bn(conv1d(h, p['w1'], p['b1'], s, pad), *p['bn1']), 0.0)
        out = bn(conv1d(out, p['w2'], p['b2'], 1,
                        ((k - 1) // 2, (k - 1) - (k - 1) // 2)), *p['bn2'])
        if residual:
            identity = (conv1d(h, p['wa'], p['ba'], s, pad)
                        if p['wa'] is not None else h)
            out = out + identity
        h = jnp.maximum(out, 0.0)

    n, _, l = h.shape
    cols = []
    for a in range(adaptive_len):
        s_i = (a * l) // adaptive_len
        e_i = -(-((a + 1) * l) // adaptive_len)
        cols.append(jnp.mean(h[:, :, s_i:e_i], axis=-1))
    flat = jnp.stack(cols, axis=-1).reshape(n, -1)                 # (N, C*A)
    z = jnp.dot(flat, params['W1'].T, precision=hi) + params['b1']
    logits = jnp.dot(z, params['W2'].T, precision=hi) + params['b2']
    return jax.nn.softmax(logits, axis=1)


if __name__ == "__main__":
    # Small config consistent with the module's constructor.
    n_classes = 5
    n_filters = [8, 16]
    kernel_sizes = [3, 3]
    strides = [1, 2]
    fully_connected_features = 32
    adaptive_average_len = 4
    residual = True

    N, L = 2, 64  # input layout: (N, C=1, L)

    key = jax.random.PRNGKey(0)
    kx, kp = jax.random.split(key)
    x = jax.random.normal(kx, (N, 1, L), jnp.float32)
    params = init_params(kp, n_filters, kernel_sizes, strides, residual,
                         fully_connected_features, adaptive_average_len,
                         n_classes)

    # One-time parameter preparation (BN folding, weight re-layout, gather matrices,
    # conv1+adapter fusion, linear1/linear2 folding).
    fused_inputs, block_meta = prepare_fused_inputs(
        params, kernel_sizes, strides, residual, N, L,
        adaptive_average_len, n_classes)

    fwd = jax.jit(lambda inp: cnn_forward(inp, fused_inputs, block_meta,
                                          adaptive_average_len, n_classes))
    probs = jax.block_until_ready(fwd(x))

    # Basic sanity + numerical check against a pure-JAX reference of the module.
    assert probs.shape == (N, n_classes)
    assert bool(jnp.all(jnp.isfinite(probs)))
    assert bool(jnp.allclose(jnp.sum(probs, axis=1), 1.0, atol=1e-5))
    ref = reference_forward(x, params, kernel_sizes, strides, residual,
                            adaptive_average_len)
    assert float(jnp.max(jnp.abs(probs - ref))) < 2e-3, "mismatch vs reference"
    print("KERNEL_OK")
</pallas_src>

<mosaic_0001>
module attributes {stable_mosaic.version = 11 : i64} {
  func.func @kernel(%arg0: memref<8x128xf32, #tpu.memory_space<vmem>>, %arg1: memref<128x384xf32, #tpu.memory_space<vmem>>, %arg2: memref<16x24xf32, #tpu.memory_space<vmem>>, %arg3: memref<16x1xf32, #tpu.memory_space<vmem>>, %arg4: memref<128x384xf32, #tpu.memory_space<vmem>>, %arg5: memref<8x24xf32, #tpu.memory_space<vmem>>, %arg6: memref<8x1xf32, #tpu.memory_space<vmem>>, %arg7: memref<128x186xf32, #tpu.memory_space<vmem>>, %arg8: memref<32x24xf32, #tpu.memory_space<vmem>>, %arg9: memref<32x1xf32, #tpu.memory_space<vmem>>, %arg10: memref<62x186xf32, #tpu.memory_space<vmem>>, %arg11: memref<16x48xf32, #tpu.memory_space<vmem>>, %arg12: memref<16x1xf32, #tpu.memory_space<vmem>>, %arg13: memref<62x8xf32, #tpu.memory_space<vmem>>, %arg14: memref<5x64xf32, #tpu.memory_space<vmem>>, %arg15: memref<5x1xf32, #tpu.memory_space<vmem>>, %arg16: memref<5x2xf32, #tpu.memory_space<vmem>>) attributes {dimension_semantics = [], scalar_prefetch = 0 : i64, scratch_operands = 0 : i64, tpu.core_type = #tpu.core_type<tc>} {
    %c0 = arith.constant 0 : index
    %c0_0 = arith.constant 0 : index
    %0 = vector.load %arg0[%c0, %c0_0] : memref<8x128xf32, #tpu.memory_space<vmem>>, vector<8x128xf32>
    %c0_1 = arith.constant 0 : index
    %c0_2 = arith.constant 0 : index
    %1 = vector.load %arg1[%c0_1, %c0_2] : memref<128x384xf32, #tpu.memory_space<vmem>>, vector<128x384xf32>
    %c0_3 = arith.constant 0 : index
    %c0_4 = arith.constant 0 : index
    %2 = vector.load %arg2[%c0_3, %c0_4] : memref<16x24xf32, #tpu.memory_space<vmem>>, vector<16x24xf32>
    %c0_5 = arith.constant 0 : index
    %c0_6 = arith.constant 0 : index
    %3 = vector.load %arg3[%c0_5, %c0_6] : memref<16x1xf32, #tpu.memory_space<vmem>>, vector<16x1xf32>
    %c0_7 = arith.constant 0 : index
    %c0_8 = arith.constant 0 : index
    %4 = vector.load %arg4[%c0_7, %c0_8] : memref<128x384xf32, #tpu.memory_space<vmem>>, vector<128x384xf32>
    %c0_9 = arith.constant 0 : index
    %c0_10 = arith.constant 0 : index
    %5 = vector.load %arg5[%c0_9, %c0_10] : memref<8x24xf32, #tpu.memory_space<vmem>>, vector<8x24xf32>
    %c0_11 = arith.constant 0 : index
    %c0_12 = arith.constant 0 : index
    %6 = vector.load %arg6[%c0_11, %c0_12] : memref<8x1xf32, #tpu.memory_space<vmem>>, vector<8x1xf32>
    %cst = arith.constant dense<0.000000e+00> : vector<8x384xf32>
    %7 = tpu.matmul %0, %1, %cst {dimension_numbers = #tpu.dot_dimension_numbers<[1], [0], [0], [1], [0, 0, 1, 1], [], []>} : vector<8x128xf32>, vector<128x384xf32>, vector<8x384xf32> -> vector<8x384xf32>
    %8 = vector.extract_strided_slice %7 {offsets = [0, 0], sizes = [8, 128], strides = [1, 1]} : vector<8x384xf32> to vector<8x128xf32>
    %9 = vector.extract_strided_slice %7 {offsets = [0, 128], sizes = [8, 128], strides = [1, 1]} : vector<8x384xf32> to vector<8x128xf32>
    %10 = vector.extract_strided_slice %7 {offsets = [0, 256], sizes = [8, 128], strides = [1, 1]} : vector<8x384xf32> to vector<8x128xf32>
    %11 = tpu.concatenate %8, %9, %10 in 0 : vector<8x128xf32>, vector<8x128xf32>, vector<8x128xf32> -> vector<24x128xf32>
    %cst_13 = arith.constant dense<0.000000e+00> : vector<16x128xf32>
    %12 = tpu.matmul %2, %11, %cst_13 {dimension_numbers = #tpu.dot_dimension_numbers<[1], [0], [0], [1], [0, 0, 1, 1], [], []>} : vector<16x24xf32>, vector<24x128xf32>, vector<16x128xf32> -> vector<16x128xf32>
    %13 = vector.broadcast %3 : vector<16x1xf32> to vector<16x128xf32>
    %14 = arith.addf %12, %13 : vector<16x128xf32>
    %15 = vector.extract_strided_slice %14 {offsets = [0, 0], sizes = [8, 128], strides = [1, 1]} : vector<16x128xf32> to vector<8x128xf32>
    %cst_14 = arith.constant 0.000000e+00 : f32
    %16 = vector.broadcast %cst_14 : f32 to vector<8x128xf32>
    %17 = arith.maximumf %15, %16 : vector<8x128xf32>
    %18 = vector.extract_strided_slice %14 {offsets = [8, 0], sizes = [8, 128], strides = [1, 1]} : vector<16x128xf32> to vector<8x128xf32>
    %cst_15 = arith.constant dense<0.000000e+00> : vector<8x384xf32>
    %19 = tpu.matmul %17, %4, %cst_15 {dimension_numbers = #tpu.dot_dimension_numbers<[1], [0], [0], [1], [0, 0, 1, 1], [], []>} : vector<8x128xf32>, vector<128x384xf32>, vector<8x384xf32> -> vector<8x384xf32>
    %20 = vector.extract_strided_slice %19 {offsets = [0, 0], sizes = [8, 128], strides = [1, 1]} : vector<8x384xf32> to vector<8x128xf32>
    %21 = vector.extract_strided_slice %19 {offsets = [0, 128], sizes = [8, 128], strides = [1, 1]} : vector<8x384xf32> to vector<8x128xf32>
    %22 = vector.extract_strided_slice %19 {offsets = [0, 256], sizes = [8, 128], strides = [1, 1]} : vector<8x384xf32> to vector<8x128xf32>
    %23 = tpu.concatenate %20, %21, %22 in 0 : vector<8x128xf32>, vector<8x128xf32>, vector<8x128xf32> -> vector<24x128xf32>
    %cst_16 = arith.constant dense<0.000000e+00> : vector<8x128xf32>
    %24 = tpu.matmul %5, %23, %cst_16 {dimension_numbers = #tpu.dot_dimension_numbers<[1], [0], [0], [1], [0, 0, 1, 1], [], []>} : vector<8x24xf32>, vector<24x128xf32>, vector<8x128xf32> -> vector<8x128xf32>
    %25 = vector.broadcast %6 : vector<8x1xf32> to vector<8x128xf32>
    %26 = arith.addf %24, %25 : vector<8x128xf32>
    %27 = arith.addf %26, %18 : vector<8x128xf32>
    %cst_17 = arith.constant 0.000000e+00 : f32
    %28 = vector.broadcast %cst_17 : f32 to vector<8x128xf32>
    %29 = arith.maximumf %27, %28 : vector<8x128xf32>
    %c0_18 = arith.constant 0 : index
    %c0_19 = arith.constant 0 : index
    %30 = vector.load %arg7[%c0_18, %c0_19] : memref<128x186xf32, #tpu.memory_space<vmem>>, vector<128x186xf32>
    %c0_20 = arith.constant 0 : index
    %c0_21 = arith.constant 0 : index
    %31 = vector.load %arg8[%c0_20, %c0_21] : memref<32x24xf32, #tpu.memory_space<vmem>>, vector<32x24xf32>
    %c0_22 = arith.constant 0 : index
    %c0_23 = arith.constant 0 : index
    %32 = vector.load %arg9[%c0_22, %c0_23] : memref<32x1xf32, #tpu.memory_space<vmem>>, vector<32x1xf32>
    %c0_24 = arith.constant 0 : index
    %c0_25 = arith.constant 0 : index
    %33 = vector.load %arg10[%c0_24, %c0_25] : memref<62x186xf32, #tpu.memory_space<vmem>>, vector<62x186xf32>
    %c0_26 = arith.constant 0 : index
    %c0_27 = arith.constant 0 : index
    %34 = vector.load %arg11[%c0_26, %c0_27] : memref<16x48xf32, #tpu.memory_space<vmem>>, vector<16x48xf32>
    %c0_28 = arith.constant 0 : index
    %c0_29 = arith.constant 0 : index
    %35 = vector.load %arg12[%c0_28, %c0_29] : memref<16x1xf32, #tpu.memory_space<vmem>>, vector<16x1xf32>
    %cst_30 = arith.constant dense<0.000000e+00> : vector<8x186xf32>
    %36 = tpu.matmul %29, %30, %cst_30 {dimension_numbers = #tpu.dot_dimension_numbers<[1], [0], [0], [1], [0, 0, 1, 1], [], []>} : vector<8x128xf32>, vector<128x186xf32>, vector<8x186xf32> -> vector<8x186xf32>
    %37 = vector.extract_strided_slice %36 {offsets = [0, 0], sizes = [8, 62], strides = [1, 1]} : vector<8x186xf32> to vector<8x62xf32>
    %38 = vector.extract_strided_slice %36 {offsets = [0, 62], sizes = [8, 62], strides = [1, 1]} : vector<8x186xf32> to vector<8x62xf32>
    %39 = vector.extract_strided_slice %36 {offsets = [0, 124], sizes = [8, 62], strides = [1, 1]} : vector<8x186xf32> to vector<8x62xf32>
    %40 = tpu.concatenate %37, %38, %39 in 0 : vector<8x62xf32>, vector<8x62xf32>, vector<8x62xf32> -> vector<24x62xf32>
    %cst_31 = arith.constant dense<0.000000e+00> : vector<32x62xf32>
    %41 = tpu.matmul %31, %40, %cst_31 {dimension_numbers = #tpu.dot_dimension_numbers<[1], [0], [0], [1], [0, 0, 1, 1], [], []>} : vector<32x24xf32>, vector<24x62xf32>, vector<32x62xf32> -> vector<32x62xf32>
    %42 = vector.broadcast %32 : vector<32x1xf32> to vector<32x62xf32>
    %43 = arith.addf %41, %42 : vector<32x62xf32>
    %44 = vector.extract_strided_slice %43 {offsets = [0, 0], sizes = [16, 62], strides = [1, 1]} : vector<32x62xf32> to vector<16x62xf32>
    %cst_32 = arith.constant 0.000000e+00 : f32
    %45 = vector.broadcast %cst_32 : f32 to vector<16x62xf32>
    %46 = arith.maximumf %44, %45 : vector<16x62xf32>
    %47 = vector.extract_strided_slice %43 {offsets = [16, 0], sizes = [16, 62], strides = [1, 1]} : vector<32x62xf32> to vector<16x62xf32>
    %cst_33 = arith.constant dense<0.000000e+00> : vector<16x186xf32>
    %48 = tpu.matmul %46, %33, %cst_33 {dimension_numbers = #tpu.dot_dimension_numbers<[1], [0], [0], [1], [0, 0, 1, 1], [], []>} : vector<16x62xf32>, vector<62x186xf32>, vector<16x186xf32> -> vector<16x186xf32>
    %49 = vector.extract_strided_slice %48 {offsets = [0, 0], sizes = [16, 62], strides = [1, 1]} : vector<16x186xf32> to vector<16x62xf32>
    %50 = vector.extract_strided_slice %48 {offsets = [0, 62], sizes = [16, 62], strides = [1, 1]} : vector<16x186xf32> to vector<16x62xf32>
    %51 = vector.extract_strided_slice %48 {offsets = [0, 124], sizes = [16, 62], strides = [1, 1]} : vector<16x186xf32> to vector<16x62xf32>
    %52 = tpu.concatenate %49, %50, %51 in 0 : vector<16x62xf32>, vector<16x62xf32>, vector<16x62xf32> -> vector<48x62xf32>
    %cst_34 = arith.constant dense<0.000000e+00> : vector<16x62xf32>
    %53 = tpu.matmul %34, %52, %cst_34 {dimension_numbers = #tpu.dot_dimension_numbers<[1], [0], [0], [1], [0, 0, 1, 1], [], []>} : vector<16x48xf32>, vector<48x62xf32>, vector<16x62xf32> -> vector<16x62xf32>
    %54 = vector.broadcast %35 : vector<16x1xf32> to vector<16x62xf32>
    %55 = arith.addf %53, %54 : vector<16x62xf32>
    %56 = arith.addf %55, %47 : vector<16x62xf32>
    %cst_35 = arith.constant 0.000000e+00 : f32
    %57 = vector.broadcast %cst_35 : f32 to vector<16x62xf32>
    %58 = arith.maximumf %56, %57 : vector<16x62xf32>
    %c0_36 = arith.constant 0 : index
    %c0_37 = arith.constant 0 : index
    %59 = vector.load %arg13[%c0_36, %c0_37] : memref<62x8xf32, #tpu.memory_space<vmem>>, vector<62x8xf32>
    %c0_38 = arith.constant 0 : index
    %c0_39 = arith.constant 0 : index
    %60 = vector.load %arg14[%c0_38, %c0_39] : memref<5x64xf32, #tpu.memory_space<vmem>>, vector<5x64xf32>
    %c0_40 = arith.constant 0 : index
    %c0_41 = arith.constant 0 : index
    %61 = vector.load %arg15[%c0_40, %c0_41] : memref<5x1xf32, #tpu.memory_space<vmem>>, vector<5x1xf32>
    %cst_42 = arith.constant dense<0.000000e+00> : vector<16x8xf32>
    %62 = tpu.matmul %58, %59, %cst_42 {dimension_numbers = #tpu.dot_dimension_numbers<[1], [0], [0], [1], [0, 0, 1, 1], [], []>} : vector<16x62xf32>, vector<62x8xf32>, vector<16x8xf32> -> vector<16x8xf32>
    %63 = vector.extract_strided_slice %62 {offsets = [0, 0], sizes = [16, 2], strides = [1, 1]} : vector<16x8xf32> to vector<16x2xf32>
    %64 = vector.extract_strided_slice %62 {offsets = [0, 2], sizes = [16, 2], strides = [1, 1]} : vector<16x8xf32> to vector<16x2xf32>
    %65 = vector.extract_strided_slice %62 {offsets = [0, 4], sizes = [16, 2], strides = [1, 1]} : vector<16x8xf32> to vector<16x2xf32>
    %66 = vector.extract_strided_slice %62 {offsets = [0, 6], sizes = [16, 2], strides = [1, 1]} : vector<16x8xf32> to vector<16x2xf32>
    %67 = tpu.concatenate %63, %64, %65, %66 in 0 : vector<16x2xf32>, vector<16x2xf32>, vector<16x2xf32>, vector<16x2xf32> -> vector<64x2xf32>
    %cst_43 = arith.constant dense<0.000000e+00> : vector<5x2xf32>
    %68 = tpu.matmul %60, %67, %cst_43 {dimension_numbers = #tpu.dot_dimension_numbers<[1], [0], [0], [1], [0, 0, 1, 1], [], []>} : vector<5x64xf32>, vector<64x2xf32>, vector<5x2xf32> -> vector<5x2xf32>
    %69 = vector.broadcast %61 : vector<5x1xf32> to vector<5x2xf32>
    %70 = arith.addf %68, %69 : vector<5x2xf32>
    %71 = vector.extract_strided_slice %70 {offsets = [0, 0], sizes = [1, 2], strides = [1, 1]} : vector<5x2xf32> to vector<1x2xf32>
    %72 = vector.extract_strided_slice %70 {offsets = [1, 0], sizes = [1, 2], strides = [1, 1]} : vector<5x2xf32> to vector<1x2xf32>
    %73 = arith.maximumf %71, %72 : vector<1x2xf32>
    %74 = vector.extract_strided_slice %70 {offsets = [2, 0], sizes = [1, 2], strides = [1, 1]} : vector<5x2xf32> to vector<1x2xf32>
    %75 = arith.maximumf %73, %74 : vector<1x2xf32>
    %76 = vector.extract_strided_slice %70 {offsets = [3, 0], sizes = [1, 2], strides = [1, 1]} : vector<5x2xf32> to vector<1x2xf32>
    %77 = arith.maximumf %75, %76 : vector<1x2xf32>
    %78 = vector.extract_strided_slice %70 {offsets = [4, 0], sizes = [1, 2], strides = [1, 1]} : vector<5x2xf32> to vector<1x2xf32>
    %79 = arith.maximumf %77, %78 : vector<1x2xf32>
    %80 = vector.broadcast %79 : vector<1x2xf32> to vector<5x2xf32>
    %81 = arith.subf %70, %80 : vector<5x2xf32>
    %82 = math.exp %81 : vector<5x2xf32>
    %83 = vector.extract_strided_slice %82 {offsets = [0, 0], sizes = [1, 2], strides = [1, 1]} : vector<5x2xf32> to vector<1x2xf32>
    %84 = vector.extract_strided_slice %82 {offsets = [1, 0], sizes = [1, 2], strides = [1, 1]} : vector<5x2xf32> to vector<1x2xf32>
    %85 = arith.addf %83, %84 : vector<1x2xf32>
    %86 = vector.extract_strided_slice %82 {offsets = [2, 0], sizes = [1, 2], strides = [1, 1]} : vector<5x2xf32> to vector<1x2xf32>
    %87 = arith.addf %85, %86 : vector<1x2xf32>
    %88 = vector.extract_strided_slice %82 {offsets = [3, 0], sizes = [1, 2], strides = [1, 1]} : vector<5x2xf32> to vector<1x2xf32>
    %89 = arith.addf %87, %88 : vector<1x2xf32>
    %90 = vector.extract_strided_slice %82 {offsets = [4, 0], sizes = [1, 2], strides = [1, 1]} : vector<5x2xf32> to vector<1x2xf32>
    %91 = arith.addf %89, %90 : vector<1x2xf32>
    %92 = vector.broadcast %91 : vector<1x2xf32> to vector<5x2xf32>
    %93 = arith.divf %82, %92 : vector<5x2xf32>
    %c0_44 = arith.constant 0 : index
    %c0_45 = arith.constant 0 : index
    %94 = vector.load %arg16[%c0_44, %c0_45] : memref<5x2xf32, #tpu.memory_space<vmem>>, vector<5x2xf32>
    tpu.vector_store %arg16[%c0_44, %c0_45], %93 {strides = array<i32>} : memref<5x2xf32, #tpu.memory_space<vmem>>, vector<5x2xf32>,
    return
  }
}

</mosaic_0001>

<bundles_post_ra>
// kernel: _lambda_.1
= control target key start
LH: loop header
LB: loop body
LE: loop exit
PB: predicated region body
PF: predicated region fallthrough
CT: control target
= control target key end

     0   :  { %s1633_s0 = inlined_call_operand.vmem [shape: f32[8,128], index: 0, kind: input, shape index: {}]   ;;  %s1634_s1 = inlined_call_operand.hbm [shape: f32[128,384], index: 1, kind: input, shape index: {}, may-alias: {1,4}]   ;;  %s1635_s2 = inlined_call_operand.hbm [shape: f32[16,24], index: 2, kind: input, shape index: {}]   ;;  %s1636_s3 = inlined_call_operand.hbm [shape: f32[16,1], index: 3, kind: input, shape index: {}]   ;;  %s1637_s4 = inlined_call_operand.hbm [shape: f32[128,384], index: 4, kind: input, shape index: {}, may-alias: {1,4}]   ;;  %s1638_s5 = inlined_call_operand.hbm [shape: f32[8,24], index: 5, kind: input, shape index: {}]   ;;  %s1639_s6 = inlined_call_operand.hbm [shape: f32[8,1], index: 6, kind: input, shape index: {}]   ;;  %s1640_s7 = inlined_call_operand.hbm [shape: f32[128,186], index: 7, kind: input, shape index: {}]   ;;  %s1641_s8 = inlined_call_operand.hbm [shape: f32[32,24], index: 8, kind: input, shape index: {}]   ;;  %s1642_s9 = inlined_call_operand.hbm [shape: f32[32,1], index: 9, kind: input, shape index: {}]   ;;  %s1643_s10 = inlined_call_operand.hbm [shape: f32[62,186], index: 10, kind: input, shape index: {}]   ;;  %s1644_s11 = inlined_call_operand.hbm [shape: f32[16,48], index: 11, kind: input, shape index: {}]   ;;  %s1645_s12 = inlined_call_operand.vmem [shape: f32[16,1], index: 12, kind: input, shape index: {}]   ;;  %s1646_s13 = inlined_call_operand.hbm [shape: f32[62,8], index: 13, kind: input, shape index: {}]   ;;  %s1647_s14 = inlined_call_operand.hbm [shape: f32[5,64], index: 14, kind: input, shape index: {}]   ;;  %s1648_s15 = inlined_call_operand.vmem [shape: f32[5,1], index: 15, kind: input, shape index: {}]   ;;  %s1649_s16 = inlined_call_operand.vmem [shape: f32[5,2], index: 16, kind: output, shape index: {}]  }
   0x1   :  { %1650 = sst [smem:[#allocation29_spill]] %s1633_s0 }
   0x2   :  { %21 = vsyncpa [#allocation3], 0 }
   0x3   :  { %22 = vsyncpa [#allocation5], 0 }
   0x4   :  { %23 = vsyncpa [#allocation8], 0 }
   0x5   :  { %24 = vsyncpa [#allocation11], 0 }
   0x6   :  { %25 = vsyncpa [#allocation14], 0 }
   0x7   :  { %26 = vsyncpa [#allocation17], 0  ;;  %s47_s23 = sshll.u32 %s1635_s2, 4  ;;  %s48_s23 = int_to_ptr.hbm [resolvable:$true] %s47_s23 }
   0x8   :  { %27 = vsyncpa [#allocation20], 0  ;;  %s1414_s24 = smov [#allocation4]   ;;  %s1415_s26 = smov 128  }
   0x9   :  { %s49_s25 = sshll.u32 %s1414_s24, 4  ;;  %s1416_s27 = smov 8   ;;  %s50_s25 = int_to_ptr.vmem [resolvable:$true] %s49_s25 }
   0xa   :  { %55 = dma.hbm_to_vmem [thread:$0]  %s48_s23, 256, %s50_s25, [#allocation5], %s1415_s26, %s1415_s26, %s1416_s27  }
   0xb   :  { %s73_s30 = sshll.u32 %s1637_s4, 4  ;;  %s1417_s0 = smov [#allocation7]   ;;  %s74_s30 = int_to_ptr.hbm [resolvable:$true] %s73_s30 }
   0xc   :  { %s75_s17 = sshll.u32 %s1417_s0, 4  ;;  %s98_s19 = sshll.u32 %s1639_s6, 4  ;;  %s76_s17 = int_to_ptr.vmem [resolvable:$true] %s75_s17  ;;  %s99_s19 = int_to_ptr.hbm [resolvable:$true] %s98_s19 }
   0xd   :  { %s1418_s20 = smov 384   ;;  %s1419_s21 = smov 24  }
   0xe   :  { %81 = dma.hbm_to_vmem [thread:$0]  %s74_s30, 6144, %s76_s17, [#allocation8], %s1418_s20, %s1418_s20, %s1419_s21  }
   0xf   :  { %s121_s24 = sshll.u32 %s1641_s8, 4  ;;  %s1420_s4 = smov [#allocation10]   ;;  %s122_s24 = int_to_ptr.hbm [resolvable:$true] %s121_s24 }
  0x10   :  { %s100_s25 = sshll.u32 %s1420_s4, 4  ;;  %s1421_s28 = smov [#allocation13]   ;;  %s101_s25 = int_to_ptr.vmem [resolvable:$true] %s100_s25 }
  0x11   :  { %103 = dma.hbm_to_vmem [thread:$0]  %s99_s19, 128, %s101_s25, [#allocation11]  }
  0x12   :  { %s123_s29 = sshll.u32 %s1421_s28, 4  ;;  %s147_s30 = sshll.u32 %s1643_s10, 4  ;;  %s124_s29 = int_to_ptr.vmem [resolvable:$true] %s123_s29  ;;  %s148_s30 = int_to_ptr.hbm [resolvable:$true] %s147_s30 }
  0x13   :  { %129 = dma.hbm_to_vmem [thread:$0]  %s122_s24, 512, %s124_s29, [#allocation14], %s1415_s26, %s1415_s26, %s1416_s27  }
  0x14   :  { %s1422_s17 = smov [#allocation16]   ;;  %s175_s22 = sshll.u32 %s1646_s13, 4  ;;  %s176_s22 = int_to_ptr.hbm [resolvable:$true] %s175_s22 }
  0x15   :  { %s149_s18 = sshll.u32 %s1422_s17, 4  ;;  %s1423_s19 = smov 256   ;;  %s150_s18 = int_to_ptr.vmem [resolvable:$true] %s149_s18 }
  0x16   :  { %s1424_s23 = smov 16   ;;  %s1425_s24 = smov [#allocation19]  }
  0x17   :  { %155 = dma.hbm_to_vmem [thread:$0]  %s148_s30, 2048, %s150_s18, [#allocation17], %s1423_s19, %s1423_s19, %s1424_s23  }
  0x18   :  { %s177_s4 = sshll.u32 %s1425_s24, 4  ;;  %s34_s10 = sshll.u32 %s1634_s1, 4  ;;  %s178_s4 = int_to_ptr.vmem [resolvable:$true] %s177_s4  ;;  %s35_s10 = int_to_ptr.hbm [resolvable:$true] %s34_s10 }
  0x19   :  { %183 = dma.hbm_to_vmem [thread:$0]  %s176_s22, 1024, %s178_s4, [#allocation20], %s1415_s26, %s1415_s26, %s1416_s27  }
  0x1a   :  { %s60_s6 = sshll.u32 %s1636_s3, 4  ;;  %s1426_s0 = smov [#allocation2]   ;;  %s61_s6 = int_to_ptr.hbm [resolvable:$true] %s60_s6 }
  0x1b   :  { %s36_s17 = sshll.u32 %s1426_s0, 4  ;;  %s1427_s30 = smov [#allocation6]   ;;  %s37_s17 = int_to_ptr.vmem [resolvable:$true] %s36_s17 }
  0x1c   :  { %42 = dma.hbm_to_vmem [thread:$0]  %s35_s10, 6144, %s37_s17, [#allocation3], %s1418_s20, %s1418_s20, %s1419_s21  }
  0x1d   :  { %s62_s1 = sshll.u32 %s1427_s30, 4  ;;  %s87_s2 = sshll.u32 %s1638_s5, 4  ;;  %s63_s1 = int_to_ptr.vmem [resolvable:$true] %s62_s1  ;;  %s88_s2 = int_to_ptr.hbm [resolvable:$true] %s87_s2 }
  0x1e   :  { %68 = dma.hbm_to_vmem [thread:$0]  %s61_s6, 256, %s63_s1, [#allocation5], %s1415_s26, %s1415_s26, %s1416_s27  }
  0x1f   :  { %s108_s24 = sshll.u32 %s1640_s7, 4  ;;  %s1428_s4 = smov [#allocation9]   ;;  %s109_s24 = int_to_ptr.hbm [resolvable:$true] %s108_s24 }
  0x20   :  { %s89_s25 = sshll.u32 %s1428_s4, 4  ;;  %s1429_s20 = smov [#allocation12]   ;;  %s90_s25 = int_to_ptr.vmem [resolvable:$true] %s89_s25 }
  0x21   :  { %92 = dma.hbm_to_vmem [thread:$0]  %s88_s2, 128, %s90_s25, [#allocation8]  }
  0x22   :  { %s110_s21 = sshll.u32 %s1429_s20, 4  ;;  %s134_s5 = sshll.u32 %s1642_s9, 4  ;;  %s111_s21 = int_to_ptr.vmem [resolvable:$true] %s110_s21  ;;  %s135_s5 = int_to_ptr.hbm [resolvable:$true] %s134_s5 }
  0x23   :  { %116 = dma.hbm_to_vmem [thread:$0]  %s109_s24, 4096, %s111_s21, [#allocation11], %s1423_s19, %s1423_s19, %s1424_s23  }
  0x24   :  { %s160_s7 = sshll.u32 %s1644_s11, 4  ;;  %s1430_s6 = smov [#allocation15]   ;;  %s161_s7 = int_to_ptr.hbm [resolvable:$true] %s160_s7 }
  0x25   :  { %s136_s0 = sshll.u32 %s1430_s6, 4  ;;  %s1431_s17 = smov [#allocation18]   ;;  %s137_s0 = int_to_ptr.vmem [resolvable:$true] %s136_s0 }
  0x26   :  { %142 = dma.hbm_to_vmem [thread:$0]  %s135_s5, 512, %s137_s0, [#allocation14], %s1415_s26, %s1415_s26, %s1416_s27  }
  0x27   :  { %s162_s9 = sshll.u32 %s1431_s17, 4  ;;  %s189_s18 = sshll.u32 %s1647_s14, 4  ;;  %s163_s9 = int_to_ptr.vmem [resolvable:$true] %s162_s9  ;;  %s190_s18 = int_to_ptr.hbm [resolvable:$true] %s189_s18 }
  0x28   :  { %168 = dma.hbm_to_vmem [thread:$0]  %s161_s7, 256, %s163_s9, [#allocation17], %s1415_s26, %s1415_s26, %s1416_s27  }
  0x29   :  { %s1432_s11 = smov [#allocation21]  }
  0x2a   :  { %s191_s19 = sshll.u32 %s1432_s11, 4  ;;  %s192_s19 = int_to_ptr.vmem [resolvable:$true] %s191_s19 }
  0x2b   :  { %194 = dma.hbm_to_vmem [thread:$0]  %s190_s18, 128, %s192_s19, [#allocation20]  }
  0x2c   :  { %1400 = dma.done.wait [#allocation3], 6144  }
  0x2d   :  { %1401 = vsyncadd [#allocation3], 4294961152 }
  0x2e   :  { %1402 = dma.done.wait [#allocation5], 512  }
  0x2f   :  { %1403 = vsyncadd [#allocation5], 4294966784 }
  0x30   :  { %1404 = dma.done.wait [#allocation8], 6272  }
  0x31   :  { %1405 = vsyncadd [#allocation8], 4294961024 }
  0x32   :  { %1406 = dma.done.wait [#allocation11], 4224  }
  0x33   :  { %1407 = vsyncadd [#allocation11], 4294963072 }
  0x34   :  { %1408 = dma.done.wait [#allocation14], 1024  }
  0x35   :  { %1409 = vsyncadd [#allocation14], 4294966272 }
  0x36   :  { %1410 = dma.done.wait [#allocation17], 2304  }
  0x37   :  { %1411 = vsyncadd [#allocation17], 4294964992 }
  0x38   :  { %1412 = dma.done.wait [#allocation20], 1152  }
  0x39   :  { %1413 = vsyncadd [#allocation20], 4294966144  ;;  %v297_v0 = vld [vmem:[#allocation2 + $0x178] sm:$0xff]  ;;  %v294_v1 = vld [vmem:[#allocation2 + $0x160] sm:$0xff]  ;;  %s1651_s27 = sld [smem:[#allocation29_spill]]  ;;  %v1433_v49 = vmov 0  }
  0x3a   :  { %392 = vmatpush.msra.mxu2 %v297_v0  ;;  %v296_v2 = vld [vmem:[#allocation2 + $0x170] sm:$0xff]  ;;  %v291_v3 = vld [vmem:[#allocation2 + $0x148] sm:$0xff]  ;;  %v293_v5 = vld [vmem:[#allocation2 + $0x158] sm:$0xff]  ;;  %1046 = vset.pattern.permute.xlu0 %v1433_v49  ;;  %vm422_vm0 = vcmask 195584   ;;  %s1434_s23 = smov 66   ;;  %s1435_s8 = smov 4  }
  0x3b   :  { %372 = vmatpush.msra.mxu1 %v296_v2  ;;  %v295_v4 = vld [vmem:[#allocation2 + $0x168] sm:$0xff]  ;;  %v292_v6 = vld [vmem:[#allocation2 + $0x150] sm:$0xff]  ;;  %v290_v7 = vld [vmem:[#allocation2 + $0x140] sm:$0xff]  ;;  %1047 = vset.pattern.permute.xlu1 %v1433_v49  ;;  %vm725_vm1 = vcmask 1045504   ;;  %vm652_vm2 = vcmask 31744   ;;  %vm718_vm3 = vcmask 506880  }
  0x3c   :  { %393 = vmatpush.msra.mxu2 %v294_v1  ;;  %352 = vmatpush.msra.mxu0 %v295_v4  ;;  %v288_v8 = vld [vmem:[#allocation2 + $0x130] sm:$0xff]  ;;  %v289_v9 = vld [vmem:[#allocation2 + $0x138] sm:$0xff]  ;;  %v287_v10 = vld [vmem:[#allocation2 + $0x128] sm:$0xff]  ;;  %vm810_vm4 = vcmask 392192   ;;  %s1437_s4 = smov 124   ;;  %s1438_s25 = smov 122  }
  0x3d   :  { %373 = vmatpush.msra.mxu1 %v293_v5  ;;  %v285_v11 = vld [vmem:[#allocation2 + $0x118] sm:$0xff]  ;;  %v286_v12 = vld [vmem:[#allocation2 + $0x120] sm:$0xff]  ;;  %v284_v13 = vld [vmem:[#allocation2 + $0x110] sm:$0xff]  ;;  %1053 = vset.pattern.permute.xlu2 %v1433_v49  ;;  %vm911_vm5 = vcmask 523264   ;;  %vm981_vm10 = vcmask 12288  }
  0x3e   :  { %394 = vmatpush.msra.mxu2 %v291_v3  ;;  %353 = vmatpush.msra.mxu0 %v292_v6  ;;  %v282_v14 = vld [vmem:[#allocation2 + $0x100] sm:$0xff]  ;;  %v283_v15 = vld [vmem:[#allocation2 + $0x108] sm:$0xff]  ;;  %v281_v16 = vld [vmem:[#allocation2 + $0xf8] sm:$0xff] }
  0x3f   :  { %374 = vmatpush.msra.mxu1 %v290_v7  ;;  %v279_v17 = vld [vmem:[#allocation2 + $0xe8] sm:$0xff]  ;;  %v280_v18 = vld [vmem:[#allocation2 + $0xf0] sm:$0xff]  ;;  %v278_v19 = vld [vmem:[#allocation2 + $0xe0] sm:$0xff] }
  0x40   :  { %395 = vmatpush.msra.mxu2 %v288_v8  ;;  %354 = vmatpush.msra.mxu0 %v289_v9  ;;  %v276_v20 = vld [vmem:[#allocation2 + $0xd0] sm:$0xff]  ;;  %v277_v21 = vld [vmem:[#allocation2 + $0xd8] sm:$0xff]  ;;  %v275_v22 = vld [vmem:[#allocation2 + $0xc8] sm:$0xff] }
  0x41   :  { %375 = vmatpush.msra.mxu1 %v287_v10  ;;  %v273_v23 = vld [vmem:[#allocation2 + $0xb8] sm:$0xff]  ;;  %v274_v24 = vld [vmem:[#allocation2 + $0xc0] sm:$0xff]  ;;  %v272_v25 = vld [vmem:[#allocation2 + $0xb0] sm:$0xff] }
  0x42   :  { %396 = vmatpush.msra.mxu2 %v285_v11  ;;  %355 = vmatpush.msra.mxu0 %v286_v12  ;;  %v270_v26 = vld [vmem:[#allocation2 + $0xa0] sm:$0xff]  ;;  %v271_v27 = vld [vmem:[#allocation2 + $0xa8] sm:$0xff]  ;;  %v269_v28 = vld [vmem:[#allocation2 + $0x98] sm:$0xff] }
  0x43   :  { %376 = vmatpush.msra.mxu1 %v284_v13  ;;  %v267_v29 = vld [vmem:[#allocation2 + $0x88] sm:$0xff]  ;;  %v268_v30 = vld [vmem:[#allocation2 + $0x90] sm:$0xff]  ;;  %v266_v31 = vld [vmem:[#allocation2 + $0x80] sm:$0xff] }
  0x44   :  { %397 = vmatpush.msra.mxu2 %v282_v14  ;;  %356 = vmatpush.msra.mxu0 %v283_v15  ;;  %v264_v32 = vld [vmem:[#allocation2 + $0x70] sm:$0xff]  ;;  %v265_v33 = vld [vmem:[#allocation2 + $0x78] sm:$0xff]  ;;  %v263_v34 = vld [vmem:[#allocation2 + $0x68] sm:$0xff] }
  0x45   :  { %377 = vmatpush.msra.mxu1 %v281_v16  ;;  %v261_v35 = vld [vmem:[#allocation2 + $0x58] sm:$0xff]  ;;  %v262_v36 = vld [vmem:[#allocation2 + $0x60] sm:$0xff]  ;;  %v260_v37 = vld [vmem:[#allocation2 + $0x50] sm:$0xff] }
  0x46   :  { %398 = vmatpush.msra.mxu2 %v279_v17  ;;  %357 = vmatpush.msra.mxu0 %v280_v18  ;;  %v258_v38 = vld [vmem:[#allocation2 + $0x40] sm:$0xff]  ;;  %v259_v39 = vld [vmem:[#allocation2 + $0x48] sm:$0xff]  ;;  %v257_v40 = vld [vmem:[#allocation2 + $0x38] sm:$0xff] }
  0x47   :  { %378 = vmatpush.msra.mxu1 %v278_v19  ;;  %v255_v41 = vld [vmem:[#allocation2 + $0x28] sm:$0xff]  ;;  %v256_v42 = vld [vmem:[#allocation2 + $0x30] sm:$0xff]  ;;  %v254_v43 = vld [vmem:[#allocation2 + $0x20] sm:$0xff] }
  0x48   :  { %399 = vmatpush.msra.mxu2 %v276_v20  ;;  %358 = vmatpush.msra.mxu0 %v277_v21  ;;  %v252_v44 = vld [vmem:[#allocation2 + $0x10] sm:$0xff]  ;;  %v253_v45 = vld [vmem:[#allocation2 + $0x18] sm:$0xff]  ;;  %v249_v46 = vld [vmem:[%s1651_s27] sm:$0xff] }
  0x49   :  { %379 = vmatpush.msra.mxu1 %v275_v22  ;;  %v251_v47 = vld [vmem:[#allocation2 + $0x8] sm:$0xff]  ;;  %v250_v48 = vld [vmem:[#allocation2] sm:$0xff]  ;;  %v300_v50 = vld [vmem:[#allocation6] sm:$0xff] }
  0x4a   :  { %400 = vmatpush.msra.mxu2 %v273_v23  ;;  %359 = vmatpush.msra.mxu0 %v274_v24  ;;  %v301_v51 = vld [vmem:[#allocation6 + $0x8] sm:$0xff]  ;;  %v348_v52 = vld [vmem:[#allocation7 + $0x170] sm:$0xff]  ;;  %v346_v55 = vld [vmem:[#allocation7 + $0x160] sm:$0xff] }
  0x4b   :  { %380 = vmatpush.msra.mxu1 %v272_v25  ;;  %414 = vperm.xlu0 %1046, %v300_v50   ;;  %v349_v53 = vld [vmem:[#allocation7 + $0x178] sm:$0xff]  ;;  %v342_v56 = vld [vmem:[#allocation7 + $0x140] sm:$0xff]  ;;  %v343_v57 = vld [vmem:[#allocation7 + $0x148] sm:$0xff] }
  0x4c   :  { %401 = vmatpush.msra.mxu2 %v270_v26  ;;  %360 = vmatpush.msra.mxu0 %v271_v27  ;;  %v345_v54 = vld [vmem:[#allocation7 + $0x158] sm:$0xff]  ;;  %v339_v58 = vld [vmem:[#allocation7 + $0x128] sm:$0xff]  ;;  %v340_v59 = vld [vmem:[#allocation7 + $0x130] sm:$0xff] }
  0x4d   :  { %381 = vmatpush.msra.mxu1 %v269_v28  ;;  %v580_v60 = vld [vmem:[#allocation15 + $0x8] sm:$0xff]  ;;  %v336_v61 = vld [vmem:[#allocation7 + $0x110] sm:$0xff]  ;;  %v298_v2 = vld [vmem:[#allocation4] sm:$0xff] }
  0x4e   :  { %402 = vmatpush.msra.mxu2 %v267_v29  ;;  %361 = vmatpush.msra.mxu0 %v268_v30  ;;  %v337_v62 = vld [vmem:[#allocation7 + $0x118] sm:$0xff]  ;;  %v347_v3 = vld [vmem:[#allocation7 + $0x168] sm:$0xff]  ;;  %v344_v4 = vld [vmem:[#allocation7 + $0x150] sm:$0xff] }
  0x4f   :  { %382 = vmatpush.msra.mxu1 %v266_v31  ;;  %v341_v5 = vld [vmem:[#allocation7 + $0x138] sm:$0xff]  ;;  %v338_v6 = vld [vmem:[#allocation7 + $0x120] sm:$0xff]  ;;  %v299_v7 = vld [vmem:[#allocation4 + $0x8] sm:$0xff] }
  0x50   :  { %403 = vmatpush.msra.mxu2 %v264_v32  ;;  %362 = vmatpush.msra.mxu0 %v265_v33  ;;  %v335_v8 = vld [vmem:[#allocation7 + $0x108] sm:$0xff]  ;;  %v332_v9 = vld [vmem:[#allocation7 + $0xf0] sm:$0xff]  ;;  %v333_v10 = vld [vmem:[#allocation7 + $0xf8] sm:$0xff] }
  0x51   :  { %383 = vmatpush.msra.mxu1 %v263_v34  ;;  %v334_v11 = vld [vmem:[#allocation7 + $0x100] sm:$0xff]  ;;  %v329_v12 = vld [vmem:[#allocation7 + $0xd8] sm:$0xff]  ;;  %v331_v14 = vld [vmem:[#allocation7 + $0xe8] sm:$0xff] }
  0x52   :  { %404 = vmatpush.msra.mxu2 %v261_v35  ;;  %363 = vmatpush.msra.mxu0 %v262_v36  ;;  %v330_v13 = vld [vmem:[#allocation7 + $0xe0] sm:$0xff]  ;;  %v327_v16 = vld [vmem:[#allocation7 + $0xc8] sm:$0xff]  ;;  %v328_v17 = vld [vmem:[#allocation7 + $0xd0] sm:$0xff] }
  0x53   :  { %384 = vmatpush.msra.mxu1 %v260_v37  ;;  %419 = vperm.xlu0 %1046, %v301_v51   ;;  %v326_v15 = vld [vmem:[#allocation7 + $0xc0] sm:$0xff]  ;;  %v323_v18 = vld [vmem:[#allocation7 + $0xa8] sm:$0xff]  ;;  %v324_v19 = vld [vmem:[#allocation7 + $0xb0] sm:$0xff] }
  0x54   :  { %405 = vmatpush.msra.mxu2 %v258_v38  ;;  %364 = vmatpush.msra.mxu0 %v259_v39  ;;  %v325_v20 = vld [vmem:[#allocation7 + $0xb8] sm:$0xff]  ;;  %v320_v21 = vld [vmem:[#allocation7 + $0x90] sm:$0xff]  ;;  %v322_v23 = vld [vmem:[#allocation7 + $0xa0] sm:$0xff] }
  0x55   :  { %385 = vmatpush.msra.mxu1 %v257_v40  ;;  %v321_v22 = vld [vmem:[#allocation7 + $0x98] sm:$0xff]  ;;  %v318_v25 = vld [vmem:[#allocation7 + $0x80] sm:$0xff]  ;;  %v319_v26 = vld [vmem:[#allocation7 + $0x88] sm:$0xff] }
  0x56   :  { %406 = vmatpush.msra.mxu2 %v255_v41  ;;  %365 = vmatpush.msra.mxu0 %v256_v42  ;;  %v317_v24 = vld [vmem:[#allocation7 + $0x78] sm:$0xff]  ;;  %v314_v27 = vld [vmem:[#allocation7 + $0x60] sm:$0xff]  ;;  %v315_v28 = vld [vmem:[#allocation7 + $0x68] sm:$0xff] }
  0x57   :  { %386 = vmatpush.msra.mxu1 %v254_v43  ;;  %v316_v29 = vld [vmem:[#allocation7 + $0x70] sm:$0xff]  ;;  %v311_v30 = vld [vmem:[#allocation7 + $0x48] sm:$0xff]  ;;  %v313_v32 = vld [vmem:[#allocation7 + $0x58] sm:$0xff] }
  0x58   :  { %407 = vmatpush.msra.mxu2 %v252_v44  ;;  %366 = vmatpush.msra.mxu0 %v253_v45  ;;  %v312_v31 = vld [vmem:[#allocation7 + $0x50] sm:$0xff]  ;;  %v309_v34 = vld [vmem:[#allocation7 + $0x38] sm:$0xff]  ;;  %v310_v35 = vld [vmem:[#allocation7 + $0x40] sm:$0xff] }
  0x59   :  { %408 = vmatmul.f32.vlgmr.msra.gmra.mxu2 %v249_v46  ;;  %387 = vmatpush.msra.mxu1 %v251_v47  ;;  %v308_v33 = vld [vmem:[#allocation7 + $0x30] sm:$0xff]  ;;  %v305_v36 = vld [vmem:[#allocation7 + $0x18] sm:$0xff]  ;;  %v306_v37 = vld [vmem:[#allocation7 + $0x20] sm:$0xff] }
  0x5a   :  { %388 = vmatmul.f32.vlgmr.msra.gmra.mxu1 %v249_v46  ;;  %367 = vmatpush.msra.mxu0 %v250_v48  ;;  %v307_v38 = vld [vmem:[#allocation7 + $0x28] sm:$0xff]  ;;  %v302_v39 = vld [vmem:[#allocation7] sm:$0xff]  ;;  %v304_v41 = vld [vmem:[#allocation7 + $0x10] sm:$0xff] }
  0x5b   :  { %368 = vmatmul.f32.vlgmr.msra.gmra.mxu0 %v249_v46  ;;  %493 = vmatpush.msrb.mxu1 %v349_v53  ;;  %v303_v40 = vld [vmem:[#allocation7 + $0x8] sm:$0xff]  ;;  %v573_v47 = vld [vmem:[#allocation12 + $0xf0] sm:$0xff]  ;;  %v571_v48 = vld [vmem:[#allocation12 + $0xe0] sm:$0xff] }
  0x5c   :  { %473 = vmatpush.msrb.mxu0 %v348_v52  ;;  %662 = vperm.xlu0 %1046, %v580_v60   ;;  %v351_v46 = vld [vmem:[#allocation10] sm:$0xff]  ;;  %v569_v49 = vld [vmem:[#allocation12 + $0xd0] sm:$0xff]  ;;  %v567_v50 = vld [vmem:[#allocation12 + $0xc0] sm:$0xff] }
  0x5d   :  { %494 = vmatpush.msrb.mxu1 %v346_v55  ;;  %515 = vperm.xlu1 %1047, %v351_v46   ;;  %v565_v51 = vld [vmem:[#allocation12 + $0xb0] sm:$0xff]  ;;  %v563_v52 = vld [vmem:[#allocation12 + $0xa0] sm:$0xff] }
  0x5e   :  { %474 = vmatpush.msrb.mxu0 %v345_v54  ;;  %v561_v53 = vld [vmem:[#allocation12 + $0x90] sm:$0xff]  ;;  %v559_v54 = vld [vmem:[#allocation12 + $0x80] sm:$0xff] }
  0x5f   :  { %495 = vmatpush.msrb.mxu1 %v343_v57  ;;  %v557_v55 = vld [vmem:[#allocation12 + $0x70] sm:$0xff] }
  0x60   :  { %475 = vmatpush.msrb.mxu0 %v342_v56  ;;  %v555_v56 = vld [vmem:[#allocation12 + $0x60] sm:$0xff]  ;;  %v553_v57 = vld [vmem:[#allocation12 + $0x50] sm:$0xff] }
  0x61   :  { %496 = vmatpush.msrb.mxu1 %v340_v59 }
  0x62   :  { %476 = vmatpush.msrb.mxu0 %v339_v58  ;;  %v551_v58 = vld [vmem:[#allocation12 + $0x40] sm:$0xff] }
  0x63   :  { %497 = vmatpush.msrb.mxu1 %v337_v62  ;;  %v350_v62 = vld [vmem:[#allocation9] sm:$0xff] }
  0x64   :  { %477 = vmatpush.msrb.mxu0 %v336_v61 }
  0x65   :  { %498 = vmatpush.msrb.mxu1 %v334_v11  ;;  %v552_v11 = vld [vmem:[#allocation12 + $0x48] sm:$0xff] }
  0x66   :  { %478 = vmatpush.msrb.mxu0 %v333_v10  ;;  %v554_v10 = vld [vmem:[#allocation12 + $0x58] sm:$0xff] }
  0x67   :  { %499 = vmatpush.msrb.mxu1 %v331_v14  ;;  %v547_v14 = vld [vmem:[#allocation12 + $0x20] sm:$0xff] }
  0x68   :  { %479 = vmatpush.msrb.mxu0 %v330_v13  ;;  %v550_v13 = vld [vmem:[#allocation12 + $0x38] sm:$0xff] }
  0x69   :  { %500 = vmatpush.msrb.mxu1 %v328_v17  ;;  %v546_v17 = vld [vmem:[#allocation12 + $0x18] sm:$0xff] }
  0x6a   :  { %480 = vmatpush.msrb.mxu0 %v327_v16  ;;  %v545_v16 = vld [vmem:[#allocation12 + $0x10] sm:$0xff] }
  0x6b   :  { %501 = vmatpush.msrb.mxu1 %v325_v20 }
  0x6c   :  { %481 = vmatpush.msrb.mxu0 %v324_v19  ;;  %v544_v19 = vld [vmem:[#allocation12 + $0x8] sm:$0xff] }
  0x6d   :  { %502 = vmatpush.msrb.mxu1 %v322_v23 }
  0x6e   :  { %482 = vmatpush.msrb.mxu0 %v321_v22 }
  0x6f   :  { %503 = vmatpush.msrb.mxu1 %v319_v26 }
  0x70   :  { %483 = vmatpush.msrb.mxu0 %v318_v25 }
  0x71   :  { %504 = vmatpush.msrb.mxu1 %v316_v29 }
  0x72   :  { %484 = vmatpush.msrb.mxu0 %v315_v28 }
  0x73   :  { %505 = vmatpush.msrb.mxu1 %v313_v32  ;;  %v598_v32 = vld [vmem:[#allocation16 + $0x78] sm:$0x3f] }
  0x74   :  { %485 = vmatpush.msrb.mxu0 %v312_v31  ;;  %v597_v31 = vld [vmem:[#allocation16 + $0x70] sm:$0x3f] }
  0x75   :  { %506 = vmatpush.msrb.mxu1 %v310_v35  ;;  %v593_v35 = vld [vmem:[#allocation16 + $0x50] sm:$0xff] }
  0x76   :  { %486 = vmatpush.msrb.mxu0 %v309_v34  ;;  %v596_v34 = vld [vmem:[#allocation16 + $0x68] sm:$0xff] }
  0x77   :  { %507 = vmatpush.msrb.mxu1 %v307_v38  ;;  %v592_v38 = vld [vmem:[#allocation16 + $0x48] sm:$0xff] }
  0x78   :  { %487 = vmatpush.msrb.mxu0 %v306_v37  ;;  %v591_v37 = vld [vmem:[#allocation16 + $0x40] sm:$0xff] }
  0x79   :  { %508 = vmatpush.msrb.mxu1 %v304_v41  ;;  %v587_v41 = vld [vmem:[#allocation16 + $0x20] sm:$0xff] }
  0x7a   :  { %488 = vmatpush.msrb.mxu0 %v303_v40  ;;  %v590_v40 = vld [vmem:[#allocation16 + $0x38] sm:$0xff] }
  0x7b   :  { %1001 = vmatpush.msk.msra.mxu1 %vm725_vm1, %v597_v31  ;;  %v844_v31 = vld [vmem:[#allocation19] sm:$0xff] }
  0xbd   :  { %v415_v42 = vpop.permute.xlu0 %414 }
  0xcf   :  { %v516_v20 = vpop.permute.xlu1 %515 }
  0xd7   :  { %v389_v0 = vpop.f32.mrf.mxu1 }
  0xd8   :  { %v369_v1 = vpop.f32.mrf.mxu0 }
  0xdc   :  { %v409_v63 = vpop.f32.mrf.mxu2 }
  0xdd   :  { %442 = vmatpush.msra.mxu3 %v409_v63 }
  0xdf   :  { %443 = vmatpush.msra.mxu3 %v389_v0  ;;  %v574_v0 = vld [vmem:[#allocation12 + $0xf8] sm:$0xff] }
  0xe1   :  { %444 = vmatpush.msra.mxu3 %v369_v1  ;;  %v572_v1 = vld [vmem:[#allocation12 + $0xe8] sm:$0xff] }
  0xe2   :  { %994 = vmatmul.msk.f32.vlgmr.msra.gmra.mxu3 %vm422_vm0, %v298_v2  ;;  %v570_v2 = vld [vmem:[#allocation12 + $0xd8] sm:$0xff] }
  0xe3   :  { %453 = vmatpush.msrb.mxu3 %v347_v3  ;;  %v568_v3 = vld [vmem:[#allocation12 + $0xc8] sm:$0xff] }
  0xe5   :  { %454 = vmatpush.msrb.mxu3 %v344_v4  ;;  %v566_v4 = vld [vmem:[#allocation12 + $0xb8] sm:$0xff] }
  0xe7   :  { %455 = vmatpush.msrb.mxu3 %v341_v5  ;;  %v564_v5 = vld [vmem:[#allocation12 + $0xa8] sm:$0xff] }
  0xe9   :  { %456 = vmatpush.msrb.mxu3 %v338_v6  ;;  %v562_v6 = vld [vmem:[#allocation12 + $0x98] sm:$0xff] }
  0xea   :  { %995 = vmatmul.msk.f32.gmra.mxu3 %vm422_vm0, %v299_v7  ;;  %v560_v7 = vld [vmem:[#allocation12 + $0x88] sm:$0xff] }
  0xeb   :  { %457 = vmatpush.msrb.mxu3 %v335_v8  ;;  %v558_v8 = vld [vmem:[#allocation12 + $0x78] sm:$0xff] }
  0xed   :  { %458 = vmatpush.msrb.mxu3 %v332_v9  ;;  %v556_v9 = vld [vmem:[#allocation12 + $0x68] sm:$0xff] }
  0xef   :  { %459 = vmatpush.msrb.mxu3 %v329_v12  ;;  %v549_v12 = vld [vmem:[#allocation12 + $0x30] sm:$0xff] }
  0xf1   :  { %460 = vmatpush.msrb.mxu3 %v326_v15  ;;  %v548_v15 = vld [vmem:[#allocation12 + $0x28] sm:$0xff] }
  0xf3   :  { %461 = vmatpush.msrb.mxu3 %v323_v18  ;;  %v543_v18 = vld [vmem:[#allocation12] sm:$0xff] }
  0xf5   :  { %462 = vmatpush.msrb.mxu3 %v320_v21  ;;  %v420_v21 = vpop.permute.xlu0 %419 }
  0xf7   :  { %463 = vmatpush.msrb.mxu3 %v317_v24 }
  0xf9   :  { %464 = vmatpush.msrb.mxu3 %v314_v27 }
  0xfb   :  { %465 = vmatpush.msrb.mxu3 %v311_v30  ;;  %v579_v30 = vld [vmem:[#allocation15] sm:$0xff] }
  0xfd   :  { %466 = vmatpush.msrb.mxu3 %v308_v33  ;;  %v595_v33 = vld [vmem:[#allocation16 + $0x60] sm:$0xff] }
  0xfe   :  { %741 = vmatpush.msra.mxu1 %v595_v33 }
  0xff   :  { %467 = vmatpush.msrb.mxu3 %v305_v36  ;;  %v594_v36 = vld [vmem:[#allocation16 + $0x58] sm:$0xff] }
 0x100   :  { %742 = vmatpush.msra.mxu1 %v593_v35 }
 0x101   :  { %468 = vmatpush.msrb.mxu3 %v302_v39  ;;  %v589_v39 = vld [vmem:[#allocation16 + $0x30] sm:$0xff] }
 0x102   :  { %743 = vmatpush.msra.mxu1 %v591_v37 }
 0x103   :  { %603 = vmatpush.msra.mxu3 %v573_v47 }
 0x104   :  { %744 = vmatpush.msra.mxu1 %v589_v39 }
 0x105   :  { %604 = vmatpush.msra.mxu3 %v571_v48  ;;  %v575_v48 = vld [vmem:[#allocation13] sm:$0xff] }
 0x106   :  { %745 = vmatpush.msra.mxu1 %v587_v41 }
 0x107   :  { %605 = vmatpush.msra.mxu3 %v569_v49  ;;  %v576_v49 = vld [vmem:[#allocation13 + $0x8] sm:$0xff] }
 0x109   :  { %606 = vmatpush.msra.mxu3 %v567_v50  ;;  %v585_v50 = vld [vmem:[#allocation16 + $0x10] sm:$0xff] }
 0x10a   :  { %746 = vmatpush.msra.mxu1 %v585_v50 }
 0x10b   :  { %607 = vmatpush.msra.mxu3 %v565_v51  ;;  %v586_v51 = vld [vmem:[#allocation16 + $0x18] sm:$0xff] }
 0x10d   :  { %608 = vmatpush.msra.mxu3 %v563_v52  ;;  %v583_v52 = vld [vmem:[#allocation16] sm:$0xff] }
 0x10e   :  { %747 = vmatpush.msra.mxu1 %v583_v52 }
 0x10f   :  { %609 = vmatpush.msra.mxu3 %v561_v53  ;;  %v584_v53 = vld [vmem:[#allocation16 + $0x8] sm:$0xff] }
 0x111   :  { %610 = vmatpush.msra.mxu3 %v559_v54 }
 0x113   :  { %611 = vmatpush.msra.mxu3 %v557_v55 }
 0x115   :  { %612 = vmatpush.msra.mxu3 %v555_v56 }
 0x117   :  { %613 = vmatpush.msra.mxu3 %v553_v57 }
 0x119   :  { %614 = vmatpush.msra.mxu3 %v551_v58  ;;  %v663_v58 = vpop.permute.xlu0 %662 }
 0x11b   :  { %615 = vmatpush.msra.mxu3 %v549_v12  ;;  %v850_v12 = vld [vmem:[#allocation19 + $0x30] sm:$0xff] }
 0x11d   :  { %616 = vmatpush.msra.mxu3 %v547_v14  ;;  %v848_v14 = vld [vmem:[#allocation19 + $0x20] sm:$0xff] }
 0x11f   :  { %617 = vmatpush.msra.mxu3 %v545_v16 }
 0x121   :  { %618 = vmatpush.msra.mxu3 %v543_v18 }
 0x165   :  { %v446_v43 = vpop.f32.mrf.mxu3 }
 0x166   :  { %v447_v44 = vadd.f32 %v446_v43, %v415_v42  ;;  %v588_v42 = vld [vmem:[#allocation16 + $0x28] sm:$0xff] }
 0x168   :  { %v452_v45 = vmax.f32 %v447_v44, 0.0 }
 0x16a   :  { %469 = vmatmul.f32.vlgmr.msrb.gmra.mxu3 %v452_v45  ;;  %489 = vmatmul.f32.vlgmr.msrb.gmra.mxu0 %v452_v45 }
 0x16b   :  { %509 = vmatmul.f32.vlgmr.msrb.gmra.mxu1 %v452_v45  ;;  %1004 = vmatpush.msk.msrb.mxu3 %vm725_vm1, %v598_v32 }
 0x16d   :  { %v449_v59 = vpop.f32.mrf.mxu3  ;;  %764 = vmatpush.msrb.mxu3 %v596_v34 }
 0x16e   :  { %v450_v23 = vadd.f32 %v449_v59, %v420_v21 }
 0x16f   :  { %765 = vmatpush.msrb.mxu3 %v594_v36 }
 0x171   :  { %766 = vmatpush.msrb.mxu3 %v592_v38 }
 0x173   :  { %767 = vmatpush.msrb.mxu3 %v590_v40 }
 0x175   :  { %768 = vmatpush.msrb.mxu3 %v588_v42 }
 0x177   :  { %769 = vmatpush.msrb.mxu3 %v586_v51  ;;  %v853_v51 = vld [vmem:[%s1648_s15] sm:$0x1f] }
 0x179   :  { %770 = vmatpush.msrb.mxu3 %v584_v53 }
 0x1e7   :  { %v490_v61 = vpop.f32.mrf.mxu0 }
 0x1e8   :  { %v510_v60 = vpop.f32.mrf.mxu1 }
 0x1e9   :  { %534 = vmatpush.msrb.mxu2 %v510_v60 }
 0x1eb   :  { %535 = vmatpush.msrb.mxu2 %v490_v61 }
 0x1ed   :  { %v470_v63 = vpop.f32.mrf.mxu3 }
 0x1ee   :  { %536 = vmatpush.msrb.mxu2 %v470_v63  ;;  %v578_v63 = vld [vmem:[#allocation13 + $0x18] sm:$0xff] }
 0x1ef   :  { %996 = vmatmul.msk.f32.vlgmr.msrb.gmra.mxu2 %vm422_vm0, %v350_v62  ;;  %v577_v62 = vld [vmem:[#allocation13 + $0x10] sm:$0xff] }
 0x1f0   :  { %623 = vmatpush.msra.mxu2 %v574_v0 }
 0x1f2   :  { %624 = vmatpush.msra.mxu2 %v572_v1 }
 0x1f4   :  { %625 = vmatpush.msra.mxu2 %v570_v2 }
 0x1f6   :  { %626 = vmatpush.msra.mxu2 %v568_v3 }
 0x1f8   :  { %627 = vmatpush.msra.mxu2 %v566_v4 }
 0x1fa   :  { %628 = vmatpush.msra.mxu2 %v564_v5 }
 0x1fc   :  { %629 = vmatpush.msra.mxu2 %v562_v6  ;;  %v602_v6 = vld [vmem:[%s1645_s12 + $0x8] sm:$0xff] }
 0x1fe   :  { %630 = vmatpush.msra.mxu2 %v560_v7 }
 0x200   :  { %631 = vmatpush.msra.mxu2 %v558_v8  ;;  %v581_v8 = vld [vmem:[#allocation15 + $0x10] sm:$0xff] }
 0x202   :  { %632 = vmatpush.msra.mxu2 %v556_v9  ;;  %v582_v9 = vld [vmem:[#allocation15 + $0x18] sm:$0xff] }
 0x204   :  { %633 = vmatpush.msra.mxu2 %v554_v10  ;;  %v601_v10 = vld [vmem:[%s1645_s12] sm:$0xff]  ;;  %s1436_s12 = smov 126  }
 0x206   :  { %634 = vmatpush.msra.mxu2 %v552_v11  ;;  %v851_v11 = vld [vmem:[#allocation19 + $0x38] sm:$0x3f] }
 0x207   :  { %1009 = vmatpush.msk.msrb.mxu1 %vm725_vm1, %v851_v11 }
 0x208   :  { %635 = vmatpush.msra.mxu2 %v550_v13  ;;  %v849_v13 = vld [vmem:[#allocation19 + $0x28] sm:$0xff] }
 0x209   :  { %872 = vmatpush.msrb.mxu1 %v850_v12 }
 0x20a   :  { %636 = vmatpush.msra.mxu2 %v548_v15 }
 0x20b   :  { %873 = vmatpush.msrb.mxu1 %v849_v13 }
 0x20c   :  { %637 = vmatpush.msra.mxu2 %v546_v17 }
 0x20d   :  { %874 = vmatpush.msrb.mxu1 %v848_v14 }
 0x20e   :  { %638 = vmatpush.msra.mxu2 %v544_v19 }
 0x272   :  { %v538_v22 = vpop.f32.mrf.mxu2 }
 0x273   :  { %v539_v24 = vadd.f32 %v538_v22, %v516_v20 }
 0x275   :  { %v541_v25 = vadd.f32 %v539_v24, %v450_v23 }
 0x277   :  { %v542_v26 = vmax.f32 %v541_v25, 0.0 }
 0x279   :  { %619 = vmatmul.f32.vlgmr.msra.gmra.mxu3 %v542_v26  ;;  %639 = vmatmul.f32.vlgmr.msra.gmra.mxu2 %v542_v26  ;;  %v599_v26 = vld [vmem:[#allocation18] sm:$0xff] }
 0x27a   :  { %1013 = vmatpush.msk.msra.mxu3 %vm725_vm1, %v851_v11 }
 0x27c   :  { %1014 = vmatpush.msra.mxu3 %v850_v12 }
 0x27e   :  { %1015 = vmatpush.msra.mxu3 %v849_v13 }
 0x280   :  { %1016 = vmatpush.msra.mxu3 %v848_v14 }
 0x2fc   :  { %v620_v27 = vpop.f32.mrf.mxu3  ;;  %v640_v28 = vpop.f32.mrf.mxu2 }
 0x2fd   :  { %v1048_v29 = vpack.i.bf16 %v640_v28, %v620_v27  ;;  %644 = vrot.lane.b32.xlu2 %v620_v27, %s1434_s23  ;;  %v847_v28 = vld [vmem:[#allocation19 + $0x18] sm:$0xff] }
 0x2fe   :  { %875 = vmatpush.msrb.mxu1 %v847_v28  ;;  %1017 = vmatpush.msra.mxu3 %v847_v28 }
 0x2ff   :  { %1049 = vrot.lane.b32.xlu1 %v1048_v29, %s1435_s8  ;;  %v846_v29 = vld [vmem:[#allocation19 + $0x10] sm:$0xff] }
 0x300   :  { %876 = vmatpush.msrb.mxu1 %v846_v29  ;;  %1018 = vmatpush.msra.mxu3 %v846_v29 }
 0x305   :  { %657 = vperm.xlu2 %1053, %v579_v30   ;;  %v845_v30 = vld [vmem:[#allocation19 + $0x8] sm:$0xff] }
 0x306   :  { %877 = vmatpush.msrb.mxu1 %v845_v30  ;;  %1019 = vmatpush.msra.mxu3 %v845_v30 }
 0x308   :  { %878 = vmatpush.msrb.mxu1 %v844_v31  ;;  %1020 = vmatpush.msra.mxu3 %v844_v31 }
 0x357   :  { %v645_v47 = vpop.permute.xlu2 %644 }
 0x35f   :  { %v658_v54 = vpop.permute.xlu2 %657 }
 0x371   :  { %v1050_v43 = vpop.permute.xlu1 %1049 }
 0x372   :  { %v1052_v44 = vunpack.i.h.bf16 %v1050_v43  ;;  %v1051_v45 = vunpack.i.l.bf16 %v1050_v43 }
 0x374   :  { %v653_v46 = vsel %vm652_vm2, %v1051_v45, %v1052_v44 }
 0x375   :  { %700 = vmatpush.msra.mxu0 %v653_v46 }
 0x377   :  { %701 = vmatpush.msra.mxu0 %v645_v47 }
 0x379   :  { %702 = vmatpush.msra.mxu0 %v620_v27  ;;  %v600_v27 = vld [vmem:[#allocation18 + $0x8] sm:$0xff] }
 0x37a   :  { %997 = vmatmul.msk.f32.vlgmr.msra.gmra.mxu0 %vm422_vm0, %v575_v48 }
 0x382   :  { %998 = vmatmul.msk.f32.gmra.mxu0 %vm422_vm0, %v576_v49 }
 0x38a   :  { %999 = vmatmul.msk.f32.gmra.mxu0 %vm422_vm0, %v577_v62 }
 0x392   :  { %1000 = vmatmul.msk.f32.gmra.mxu0 %vm422_vm0, %v578_v63 }
 0x3f7   :  { %v704_v55 = vpop.f32.mrf.mxu0 }
 0x3f8   :  { %v705_v56 = vadd.f32 %v704_v55, %v658_v54 }
 0x3fa   :  { %v716_v57 = vmax.f32 %v705_v56, 0.0 }
 0x3fc   :  { %1002 = vmatmul.msk.f32.vlgmr.msra.gmra.mxu1 %vm718_vm3, %v716_v57  ;;  %1005 = vmatmul.msk.f32.vlgmr.msrb.gmra.mxu3 %vm718_vm3, %v716_v57 }
 0x3ff   :  { %v707_v59 = vpop.f32.mrf.mxu0 }
 0x400   :  { %v708_v60 = vadd.f32 %v707_v59, %v663_v58 }
 0x402   :  { %v717_v61 = vmax.f32 %v708_v60, 0.0 }
 0x404   :  { %1003 = vmatmul.msk.f32.gmra.mxu1 %vm718_vm3, %v717_v61  ;;  %1006 = vmatmul.msk.f32.gmra.mxu3 %vm718_vm3, %v717_v61  ;;  %v852_v61 = vld [vmem:[#allocation21] sm:$0x1f] }
 0x407   :  { %v710_v33 = vpop.f32.mrf.mxu0 }
 0x40f   :  { %v713_v41 = vpop.f32.mrf.mxu0 }
 0x479   :  { %v749_v0 = vpop.f32.mrf.mxu1 }
 0x47f   :  { %v772_v1 = vpop.f32.mrf.mxu3 }
 0x480   :  { %v1059_v2 = vpack.i.bf16 %v772_v1, %v749_v0 }
 0x481   :  { %v752_v3 = vpop.f32.mrf.mxu1 }
 0x482   :  { %v1064_v4 = vpack.i.bf16 %v749_v0, %v752_v3  ;;  %1060 = vrot.lane.b32.xlu2 %v1059_v2, %s1435_s8 }
 0x484   :  { %1065 = vrot.lane.b32.xlu0 %v1064_v4, %s1434_s23 }
 0x487   :  { %v775_v5 = vpop.f32.mrf.mxu3 }
 0x488   :  { %v1054_v7 = vpack.i.bf16 %v775_v5, %v752_v3 }
 0x48a   :  { %807 = vperm.xlu2 %1053, %v602_v6   ;;  %1055 = vrot.lane.b32.xlu1 %v1054_v7, %s1435_s8 }
 0x48c   :  { %667 = vperm.xlu0 %1046, %v581_v8  }
 0x492   :  { %672 = vperm.xlu1 %1047, %v582_v9  }
 0x49a   :  { %802 = vperm.xlu1 %1047, %v601_v10  }
 0x4dc   :  { %v1061_v15 = vpop.permute.xlu2 %1060 }
 0x4dd   :  { %v1063_v17 = vunpack.i.h.bf16 %v1061_v15  ;;  %v1062_v18 = vunpack.i.l.bf16 %v1061_v15 }
 0x4df   :  { %v796_v23 = vsel %vm652_vm2, %v1062_v18, %v1063_v17 }
 0x4e4   :  { %v808_v42 = vpop.permute.xlu2 %807 }
 0x4f6   :  { %v1066_v21 = vpop.permute.xlu0 %1065 }
 0x4f7   :  { %v1067_v24 = vunpack.i.l.bf16 %v1066_v21  ;;  %v1068_v25 = vunpack.i.h.bf16 %v1066_v21 }
 0x4fc   :  { %v1056_v16 = vpop.permute.xlu1 %1055 }
 0x4fd   :  { %v1058_v19 = vunpack.i.h.bf16 %v1056_v16  ;;  %v1057_v20 = vunpack.i.l.bf16 %v1056_v16 }
 0x4fe   :  { %v668_v34 = vpop.permute.xlu0 %667 }
 0x4ff   :  { %v797_v22 = vsel %vm652_vm2, %v1057_v20, %v1058_v19  ;;  %v711_v37 = vadd.f32 %v710_v33, %v668_v34 }
 0x500   :  { %827 = vmatpush.msrb.mxu2 %v797_v22 }
 0x502   :  { %828 = vmatpush.msrb.mxu2 %v796_v23 }
 0x504   :  { %829 = vmatpush.msrb.mxu2 %v1067_v24  ;;  %v673_v32 = vpop.permute.xlu1 %672 }
 0x505   :  { %v714_v44 = vadd.f32 %v713_v41, %v673_v32 }
 0x506   :  { %830 = vmatpush.msrb.mxu2 %v1068_v25 }
 0x508   :  { %831 = vmatpush.msrb.mxu2 %v752_v3 }
 0x50a   :  { %832 = vmatpush.msrb.mxu2 %v749_v0 }
 0x50b   :  { %1007 = vmatmul.msk.f32.vlgmr.msrb.gmra.mxu2 %vm810_vm4, %v599_v26 }
 0x50c   :  { %v803_v35 = vpop.permute.xlu1 %802 }
 0x513   :  { %1008 = vmatmul.msk.f32.gmra.mxu2 %vm810_vm4, %v600_v27 }
 0x58e   :  { %v834_v36 = vpop.f32.mrf.mxu2 }
 0x58f   :  { %v835_v38 = vadd.f32 %v834_v36, %v803_v35 }
 0x591   :  { %v840_v39 = vadd.f32 %v835_v38, %v711_v37 }
 0x593   :  { %v842_v40 = vmax.f32 %v840_v39, 0.0 }
 0x595   :  { %1010 = vmatmul.msk.f32.vlgmr.msrb.gmra.mxu1 %vm718_vm3, %v842_v40 }
 0x596   :  { %v837_v43 = vpop.f32.mrf.mxu2 }
 0x597   :  { %v838_v45 = vadd.f32 %v837_v43, %v808_v42 }
 0x599   :  { %v841_v46 = vadd.f32 %v838_v45, %v714_v44 }
 0x59b   :  { %v843_v47 = vmax.f32 %v841_v46, 0.0 }
 0x59d   :  { %1011 = vmatmul.msk.f32.vlgmr.msra.gmra.mxu3 %vm718_vm3, %v843_v47 }
 0x612   :  { %v880_v48 = vpop.f32.mrf.mxu1 }
 0x620   :  { %v883_v49 = vpop.f32.mrf.mxu3 }
 0x621   :  { %v1079_v50 = vpack.i.bf16 %v880_v48, %v883_v49 }
 0x623   :  { %1080 = vrot.lane.b32.xlu1 %v1079_v50, %s1436_s12  ;;  %1075 = vrot.lane.b32.xlu0 %v1079_v50, %s1437_s4 }
 0x624   :  { %1070 = vrot.lane.b32.xlu2 %v1079_v50, %s1438_s25 }
 0x62c   :  { %908 = vperm.xlu2 %1053, %v853_v51  }
 0x67e   :  { %v1071_v52 = vpop.permute.xlu2 %1070 }
 0x67f   :  { %v1072_v53 = vunpack.i.l.bf16 %v1071_v52  ;;  %v1073_v54 = vunpack.i.h.bf16 %v1071_v52 }
 0x681   :  { %923 = vmatpush.msra.mxu2 %v1072_v53 }
 0x683   :  { %924 = vmatpush.msra.mxu2 %v1073_v54 }
 0x686   :  { %v909_v62 = vpop.permute.xlu2 %908 }
 0x695   :  { %v1076_v55 = vpop.permute.xlu0 %1075  ;;  %v1081_v57 = vpop.permute.xlu1 %1080 }
 0x696   :  { %v1077_v56 = vunpack.i.l.bf16 %v1076_v55  ;;  %v1078_v58 = vunpack.i.h.bf16 %v1076_v55  ;;  %v1082_v59 = vunpack.i.l.bf16 %v1081_v57  ;;  %v1083_v60 = vunpack.i.h.bf16 %v1081_v57 }
 0x698   :  { %925 = vmatpush.msra.mxu2 %v1077_v56 }
 0x69a   :  { %926 = vmatpush.msra.mxu2 %v1078_v58 }
 0x69c   :  { %927 = vmatpush.msra.mxu2 %v1082_v59 }
 0x69e   :  { %928 = vmatpush.msra.mxu2 %v1083_v60 }
 0x6a0   :  { %929 = vmatpush.msra.mxu2 %v883_v49 }
 0x6a2   :  { %930 = vmatpush.msra.mxu2 %v880_v48 }
 0x6a3   :  { %1012 = vmatmul.msk.f32.vlgmr.msra.gmra.mxu2 %vm911_vm5, %v852_v61 }
 0x726   :  { %v932_v63 = vpop.f32.mrf.mxu2 }
 0x727   :  { %v933_v0 = vadd.f32 %v932_v63, %v909_v62 }
 0x729   :  { %v936_v1 = vrot.slane %v933_v0, 1  ;;  %v939_v3 = vrot.slane %v933_v0, 2  ;;  %v942_v5 = vrot.slane %v933_v0, 3  ;;  %v945_v7 = vrot.slane %v933_v0, 4 }
 0x72b   :  { %v938_v2 = vmax.f32 %v933_v0, %v936_v1 }
 0x72d   :  { %v941_v4 = vmax.f32 %v938_v2, %v939_v3 }
 0x72f   :  { %v944_v6 = vmax.f32 %v941_v4, %v942_v5 }
 0x731   :  { %v947_v8 = vmax.f32 %v944_v6, %v945_v7 }
 0x733   :  { %v948_v9 = vperm.slane %v947_v8, 0 }
 0x735   :  { %v949_v10 = vsub.f32 %v933_v0, %v948_v9 }
 0x737   :  { %v950_v11 = vmul.f32 1.442695, %v949_v10 }
 0x739   :  { %1084 = vpow2.f32 %v950_v11 }
 0x73f   :  { %v1085_v12 = vpop.eup %1084 }
 0x740   :  { %v953_v13 = vrot.slane %v1085_v12, 1  ;;  %v956_v15 = vrot.slane %v1085_v12, 2  ;;  %v959_v17 = vrot.slane %v1085_v12, 3  ;;  %v962_v19 = vrot.slane %v1085_v12, 4 }
 0x742   :  { %v955_v14 = vadd.f32 %v1085_v12, %v953_v13 }
 0x744   :  { %v958_v16 = vadd.f32 %v956_v15, %v955_v14 }
 0x746   :  { %v961_v18 = vadd.f32 %v959_v17, %v958_v16 }
 0x748   :  { %v964_v20 = vadd.f32 %v962_v19, %v961_v18 }
 0x74a   :  { %v965_v21 = vperm.slane %v964_v20, 0 }
 0x74c   :  { %1086 = vrcp.f32 %v965_v21  ;;  %v977_v25 = vand.u32 2147483648, %v965_v21  ;;  %v975_v27 = vand.u32 2147483647, %v965_v21  ;;  %vm971_vm7 = vweird.f32 %v965_v21 }
 0x74e   :  { %v978_v29 = vor.u32 1.1754944e-38, %v977_v25  ;;  %vm976_vm9 = vcmp.eq.f32.partialorder %v975_v27, 8.507059e+37 }
 0x752   :  { %v1087_v22 = vpop.eup %1086 }
 0x753   :  { %v967_v23 = vmul.f32 %v1087_v22, %v965_v21  ;;  %vm972_vm6 = vweird.f32 %v1087_v22 }
 0x754   :  { %vm973_vm8 = vmor %vm971_vm7, %vm972_vm6 }
 0x755   :  { %v968_v24 = vsub.f32 1.0, %v967_v23 }
 0x757   :  { %v969_v26 = vmul.f32 %v1087_v22, %v968_v24 }
 0x759   :  { %v970_v28 = vadd.f32 %v1087_v22, %v969_v26 }
 0x75b   :  { %v974_v30 = vsel %vm973_vm8, %v1087_v22, %v970_v28 }
 0x75c   :  { %v979_v31 = vsel %vm976_vm9, %v978_v29, %v974_v30 }
 0x75d   :  { %v980_v32 = vmul.f32 %v1085_v12, %v979_v31 }
 0x75f   :  { %982 = vst.msk [vmem:[%s1649_s16] sm:$0x1f] %vm981_vm10, %v980_v32 }
 0x760   :  { %987 = vsyncpa [#allocation3], 1 }
 0x761   :  { %988 = vsyncpa [#allocation5], 1 }
 0x762   :  { %989 = vsyncpa [#allocation8], 1 }
 0x763   :  { %990 = vsyncpa [#allocation11], 1 }
 0x764   :  { %991 = vsyncpa [#allocation14], 1 }
 0x765   :  { %992 = vsyncpa [#allocation17], 1 }
 0x766   :  { %993 = vsyncpa [#allocation20], 1 }

</bundles_post_ra>
